<compile_context>
chip_gen: v6e
topology: v6e:2x2x1
jax: 0.10.0
libtpu: 0.0.40
codegen_flags: <defaults>
</compile_context>

<pallas_src>
import functools

import jax
import jax.numpy as jnp
from jax.experimental import pallas as pl
from jax.experimental.pallas import tpu as pltpu

BN_EPS = 1e-5


# ----------------------------------------------------------------------------
# In-kernel helpers
# ----------------------------------------------------------------------------
def _conv3_rows(xh, t_ref, b_ref):
    """3x3 conv of BT*TH output rows as three accumulated MXU dots.

    xh:    (BT, TH+2, W*Cin) halo-assembled rows (OOB halo rows already zeroed).
    t_ref: (3, W*Cin, W*Cout) banded per-kh weight matrices.
    b_ref: (1, W*Cout) f32 bias (tiled over W).
    Returns (BT*TH, W*Cout) f32 = conv + bias.
    """
    bt, thp2, wc_in = xh.shape
    th = thp2 - 2
    cd = t_ref.dtype                       # MXU compute dtype (f32 or bf16)
    acc = None
    for k in range(3):                     # accumulate in the MXU result buffer
        part = xh[:, k:k + th, :].reshape(bt * th, wc_in).astype(cd)
        d = jnp.dot(part, t_ref[k], preferred_element_type=jnp.float32)
        acc = d if acc is None else acc + d
    return acc + b_ref[...]


def _tile_stats(yf):
    """Per-lane (sum, sumsq) of a (M, W*C) f32 tile -> (2, W*C), lane-dense.

    Channel folding over the W groups happens in the wrapper (tiny jnp op);
    no lane->sublane relayout inside the kernel.
    """
    s = jnp.sum(yf, axis=0, keepdims=True)
    ss = jnp.sum(yf * yf, axis=0, keepdims=True)
    return jnp.concatenate([s, ss], axis=0)


# ----------------------------------------------------------------------------
# Kernels
# ----------------------------------------------------------------------------
def _conv1_kernel(xc_ref, xu_ref, xd_ref, t_ref, b_ref, y_ref, st_ref):
    r = pl.program_id(1)
    last = pl.num_programs(1) - 1
    xc = xc_ref[...]                                        # (BT, TH, W*Cin)
    # Scalar-predicated 1-row halos (zero when the tile touches the border).
    top = xu_ref[:, 7:8, :] * (r > 0).astype(xc.dtype)
    bot = xd_ref[:, 0:1, :] * (r < last).astype(xc.dtype)
    xh = jnp.concatenate([top, xc, bot], axis=1)            # (BT, TH+2, W*Cin)
    acc = _conv3_rows(xh, t_ref, b_ref)                     # (BT*TH, W*C1) f32
    y = acc.astype(y_ref.dtype)
    y_ref[...] = y.reshape(y_ref.shape)
    st_ref[0, 0] = _tile_stats(y.astype(jnp.float32))       # stats of stored values


def _bn_relu_conv2_kernel(yc_ref, yu_ref, yd_ref, ss_ref, t_ref, b_ref,
                          y2_ref, st_ref):
    r = pl.program_id(1)
    last = pl.num_programs(1) - 1
    scale = ss_ref[0:1, :]                                  # (1, W*C1) f32
    shift = ss_ref[1:2, :]

    def bn_relu(v):                                         # pure lane-aligned FMA
        return jnp.maximum(v.astype(jnp.float32) * scale + shift, 0.0)

    a_c = bn_relu(yc_ref[...])                              # (BT, TH, W*C1)
    # conv2's zero padding applies AFTER BN+ReLU -> predicate the BN'd halo rows.
    a_u = bn_relu(yu_ref[:, 7:8, :]) * (r > 0).astype(jnp.float32)
    a_d = bn_relu(yd_ref[:, 0:1, :]) * (r < last).astype(jnp.float32)
    xh = jnp.concatenate([a_u, a_c, a_d], axis=1)           # (BT, TH+2, W*C1)
    acc = _conv3_rows(xh, t_ref, b_ref)                     # (BT*TH, W*C2) f32
    y = acc.astype(y2_ref.dtype)
    y2_ref[...] = y.reshape(y2_ref.shape)
    st_ref[0, 0] = _tile_stats(y.astype(jnp.float32))


def _bn_relu_pool_kernel(yc_ref, ss_ref, out_ref, pool_ref, *, c):
    scale = ss_ref[0:1, :]
    shift = ss_ref[1:2, :]
    a = jnp.maximum(yc_ref[...].astype(jnp.float32) * scale + shift, 0.0)
    out_ref[...] = a.astype(out_ref.dtype)                  # (BT, TH, W*C2)
    bt, th, wc = a.shape
    w = wc // c
    # Fused 2x2 max pool, stride 2.
    ar = a.reshape(bt, th // 2, 2, wc)
    rmax = jnp.maximum(ar[:, :, 0, :], ar[:, :, 1, :])      # (BT, TH/2, W*C)
    cr = rmax.reshape(bt, th // 2, w // 2, 2, c)
    p = jnp.maximum(cr[:, :, :, 0, :], cr[:, :, :, 1, :])   # (BT, TH/2, W/2, C)
    # Lane-dense store: pack two pooled rows per slab row -> last dim == W*C.
    pool_ref[...] = p.reshape(bt, th // 4, 2 * (w // 2) * c).astype(pool_ref.dtype)


# ----------------------------------------------------------------------------
# Wrapper-side weight preprocessing, stats folding and spec plumbing
# ----------------------------------------------------------------------------
def _conv_weights_to_banded(w, W):
    """(3, 3, Cin, Cout) conv weights -> (3, W*Cin, W*Cout) per-kh banded matrices.

    T[kh, wi*Cin + ci, wo*Cout + co] = w[kh, wi - wo + 1, ci, co] for |wi-wo| <= 1,
    else 0.  W-direction zero padding is implicit in the zero bands.
    (For large W one would fall back to K=9*Cin im2col tiles; at these widths the
    banded matrices are tiny and VMEM-friendly, even on v7x's 64 MiB VMEM.)
    """
    KH, KW, Cin, Cout = w.shape
    wi = jnp.arange(W)[:, None]
    wo = jnp.arange(W)[None, :]
    kw = wi - wo + (KW // 2)
    valid = (kw >= 0) & (kw < KW)
    kw_c = jnp.clip(kw, 0, KW - 1)
    blk = w[:, kw_c, :, :]                                  # (KH, W, W, Cin, Cout)
    blk = jnp.where(valid[None, :, :, None, None], blk, 0.0)
    t = jnp.transpose(blk, (0, 1, 3, 2, 4))                 # (KH, W, Cin, W, Cout)
    return t.reshape(KH, W * Cin, W * Cout)


def _bn_scale_shift(st, gamma, beta, W, C, inv_n):
    """Fold per-tile lane-dense (sum, sumsq) into pre-tiled BN scale/shift (2, W*C).

    Hoisted out of the kernels: one tiny XLA reduction instead of a per-grid-step
    reduction + rsqrt + relayout.
    """
    tot = jnp.sum(st, axis=(0, 1)).reshape(2, W, C).sum(axis=1)   # (2, C)
    mean = tot[0] * inv_n
    # Single-pass E[x^2]-E[x]^2; clamp to guard cancellation.  TODO(synk): switch
    # to a shifted two-pass accumulation if reused with large-magnitude inputs.
    var = jnp.maximum(tot[1] * inv_n - mean * mean, 0.0)
    scale = gamma * jax.lax.rsqrt(var + BN_EPS)
    shift = beta - mean * scale
    return jnp.concatenate(
        [jnp.tile(scale, W)[None, :], jnp.tile(shift, W)[None, :]], axis=0
    ).astype(jnp.float32)                                          # (2, W*C)


def _pick_tiles(N, H, tile_h=None, batch_tile=None):
    if tile_h is None:
        tile_h = H
        for cand in range(min(H, 256), 0, -1):           # big tiles amortize overhead
            if H % cand == 0 and cand % 8 == 0 and (cand % 32 == 0 or cand == H):
                tile_h = cand
                break
    assert H % tile_h == 0 and tile_h % 8 == 0
    # Packed pool store needs TH//4 rows to be sublane-aligned (or a full block).
    assert tile_h % 32 == 0 or tile_h == H
    if batch_tile is None:
        batch_tile = 1
        target = max(1, 256 // tile_h)                   # aim for >=256 MXU rows
        for cand in range(min(N, target), 0, -1):
            if N % cand == 0:
                batch_tile = cand
                break
    assert N % batch_tile == 0
    return batch_tile, tile_h


def _row_tile_specs(H, WC, BT, TH):
    """Center tile + 8-row up/down halo BlockSpecs for an (N, H, WC) slab."""
    rb = TH // 8
    nb8 = H // 8
    center = pl.BlockSpec((BT, TH, WC), lambda n, r: (n, r, 0))
    up = pl.BlockSpec((BT, 8, WC), lambda n, r: (n, jnp.maximum(r * rb - 1, 0), 0))
    down = pl.BlockSpec((BT, 8, WC),
                        lambda n, r: (n, jnp.minimum((r + 1) * rb, nb8 - 1), 0))
    return center, up, down


def _vmem_limit_bytes():
    # Generation-aware scoped-VMEM limit: ~3/4 of physical, capped at 96 MiB
    # (v5e/v6e: 96 MiB, v7x: ~48 MiB of its 64 MiB).
    try:
        cap = int(pltpu.get_tpu_info().vmem_capacity_bytes)
    except Exception:
        cap = 64 * 1024 * 1024
    return max(32 * 1024 * 1024, min(cap * 3 // 4, 96 * 1024 * 1024))


def _compiler_params():
    # Both grid axes are parallel (no cross-step accumulators); on v7x keep the
    # larger parallel extent >= 2 steps so both TensorCores stay busy.
    return pltpu.CompilerParams(
        dimension_semantics=("parallel", "parallel"),
        vmem_limit_bytes=_vmem_limit_bytes())


# ----------------------------------------------------------------------------
# Module wrapper (NCHW in / NCHW out, like PyTorch)
# ----------------------------------------------------------------------------
def downsample_layer_forward(x_nchw, params, *, tile_h=None, batch_tile=None,
                             store_dtype=jnp.float32):
    N, Cin, H, W = x_nchw.shape
    C1 = params["w1"].shape[-1]
    C2 = params["w2"].shape[-1]
    assert H % 8 == 0 and H % 4 == 0 and W % 2 == 0
    BT, TH = _pick_tiles(N, H, tile_h, batch_tile)
    NB, R = N // BT, H // TH
    grid = (NB, R)
    inv_n = 1.0 / float(N * H * W)
    cp = _compiler_params()
    f32 = jnp.float32
    is_f32_store = jnp.dtype(store_dtype) == jnp.dtype(f32)

    # Boundary glue: NCHW -> lane-dense (N, H, W*C) slab.
    x = jnp.transpose(x_nchw, (0, 2, 3, 1)).reshape(N, H, W * Cin).astype(store_dtype)

    # Weight preprocessing (once per weights).  bf16 mode: MXU operands in bf16,
    # bias / BN / stats stay f32.
    T1 = _conv_weights_to_banded(params["w1"], W).astype(store_dtype)
    T2 = _conv_weights_to_banded(params["w2"], W).astype(store_dtype)
    b1w = jnp.tile(params["b1"], W)[None, :].astype(f32)            # (1, W*C1)
    b2w = jnp.tile(params["b2"], W)[None, :].astype(f32)            # (1, W*C2)

    # ---- pass 1: conv1 + bias, per-tile lane-dense (sum, sumsq) for BN1 ----
    xc_spec, xu_spec, xd_spec = _row_tile_specs(H, W * Cin, BT, TH)
    y1, st1 = pl.pallas_call(
        _conv1_kernel,
        grid=grid,
        in_specs=[xc_spec, xu_spec, xd_spec,
                  pl.BlockSpec((3, W * Cin, W * C1), lambda n, r: (0, 0, 0)),
                  pl.BlockSpec((1, W * C1), lambda n, r: (0, 0))],
        out_specs=(pl.BlockSpec((BT, TH, W * C1), lambda n, r: (n, r, 0)),
                   pl.BlockSpec((1, 1, 2, W * C1), lambda n, r: (n, r, 0, 0))),
        out_shape=(jax.ShapeDtypeStruct((N, H, W * C1), store_dtype),
                   jax.ShapeDtypeStruct((NB, R, 2, W * C1), f32)),
        compiler_params=cp,
    )(x, x, x, T1, b1w)

    # BN1 scale/shift hoisted to the wrapper (tiny jnp reduction).
    ss1 = _bn_scale_shift(st1, params["g1"], params["be1"], W, C1, inv_n)

    # ---- pass 2: BN1 + ReLU + conv2 + bias, per-tile (sum, sumsq) for BN2 ----
    yc_spec, yu_spec, yd_spec = _row_tile_specs(H, W * C1, BT, TH)
    y2, st2 = pl.pallas_call(
        _bn_relu_conv2_kernel,
        grid=grid,
        in_specs=[yc_spec, yu_spec, yd_spec,
                  pl.BlockSpec((2, W * C1), lambda n, r: (0, 0)),
                  pl.BlockSpec((3, W * C1, W * C2), lambda n, r: (0, 0, 0)),
                  pl.BlockSpec((1, W * C2), lambda n, r: (0, 0))],
        out_specs=(pl.BlockSpec((BT, TH, W * C2), lambda n, r: (n, r, 0)),
                   pl.BlockSpec((1, 1, 2, W * C2), lambda n, r: (n, r, 0, 0))),
        out_shape=(jax.ShapeDtypeStruct((N, H, W * C2), store_dtype),
                   jax.ShapeDtypeStruct((NB, R, 2, W * C2), f32)),
        compiler_params=cp,
    )(y1, y1, y1, ss1, T2, b2w)

    ss2 = _bn_scale_shift(st2, params["g2"], params["be2"], W, C2, inv_n)

    # ---- pass 3: BN2 + ReLU -> out, fused lane-dense-packed 2x2 MaxPool ----
    # Alias y2's HBM buffer to the full-resolution output when dtypes match.
    alias = {0: 0} if is_f32_store else {}
    out_f, out2_p = pl.pallas_call(
        functools.partial(_bn_relu_pool_kernel, c=C2),
        grid=grid,
        in_specs=[pl.BlockSpec((BT, TH, W * C2), lambda n, r: (n, r, 0)),
                  pl.BlockSpec((2, W * C2), lambda n, r: (0, 0))],
        out_specs=(pl.BlockSpec((BT, TH, W * C2), lambda n, r: (n, r, 0)),
                   pl.BlockSpec((BT, TH // 4, W * C2), lambda n, r: (n, r, 0))),
        out_shape=(jax.ShapeDtypeStruct((N, H, W * C2), f32),
                   jax.ShapeDtypeStruct((N, H // 4, W * C2), f32)),
        compiler_params=cp,
        input_output_aliases=alias,
    )(y2, ss2)

    # Boundary glue: lane-dense -> NCHW; unpack the 2-rows-per-slab-row pooling.
    out = jnp.transpose(out_f.reshape(N, H, W, C2), (0, 3, 1, 2))
    out2 = out2_p.reshape(N, H // 4, 2, W // 2, C2).reshape(N, H // 2, W // 2, C2)
    out2 = jnp.transpose(out2, (0, 3, 1, 2))
    return out, out2
    # TODO(synk): BatchNorm running_mean/running_var buffer updates (training-time
    # side effect only; forward output unaffected) are not emulated.


# ----------------------------------------------------------------------------
# Parameter init (PyTorch-like) and pure-JAX reference (sanity check only)
# ----------------------------------------------------------------------------
def init_params(key, in_ch, out_ch):
    k1, k2, k3, k4 = jax.random.split(key, 4)

    def conv_init(kw_, kb_, cin, cout):
        fan_in = cin * 9
        w = jax.random.normal(kw_, (3, 3, cin, cout), jnp.float32) * (2.0 / fan_in) ** 0.5
        b = jax.random.uniform(kb_, (cout,), jnp.float32,
                               minval=-1.0 / fan_in ** 0.5, maxval=1.0 / fan_in ** 0.5)
        return w, b

    w1, b1 = conv_init(k1, k2, in_ch, out_ch)
    w2, b2 = conv_init(k3, k4, out_ch, out_ch)
    return {
        "w1": w1, "b1": b1,
        "g1": jnp.ones((out_ch,), jnp.float32), "be1": jnp.zeros((out_ch,), jnp.float32),
        "w2": w2, "b2": b2,
        "g2": jnp.ones((out_ch,), jnp.float32), "be2": jnp.zeros((out_ch,), jnp.float32),
    }


def _reference_forward(x_nchw, params):
    def block(x, w, b, g, be):
        w_oihw = jnp.transpose(w, (3, 2, 0, 1))
        y = jax.lax.conv_general_dilated(
            x, w_oihw, (1, 1), "SAME",
            dimension_numbers=("NCHW", "OIHW", "NCHW"),
            precision=jax.lax.Precision.HIGHEST) + b[None, :, None, None]
        mean = y.mean(axis=(0, 2, 3), keepdims=True)
        var = ((y - mean) ** 2).mean(axis=(0, 2, 3), keepdims=True)
        y = (y - mean) / jnp.sqrt(var + BN_EPS) * g[None, :, None, None] + be[None, :, None, None]
        return jnp.maximum(y, 0.0)

    out = block(block(x_nchw, params["w1"], params["b1"], params["g1"], params["be1"]),
                params["w2"], params["b2"], params["g2"], params["be2"])
    N, C, H, W = out.shape
    out2 = out.reshape(N, C, H // 2, 2, W // 2, 2).max(axis=(3, 5))
    return out, out2


if __name__ == "__main__":
    # (N, in_ch, out_ch, H, W, tile_h, batch_tile, store_dtype, tol)
    #  - config 1: reference size, single tile.
    #  - config 2: multi row-tile + multi batch-tile grid (exercises halos / grid).
    #  - config 3: bf16 intermediate slabs / MXU operands (looser tolerance).
    configs = [
        (2, 4, 8, 16, 16, None, None, jnp.float32, 1e-2),
        (2, 4, 8, 64, 16, 32, 1, jnp.float32, 1e-2),
        (2, 4, 8, 32, 16, None, None, jnp.bfloat16, 5e-2),
    ]
    for (N, in_ch, out_ch, H, W, tile_h, batch_tile, sdt, tol) in configs:
        key = jax.random.PRNGKey(0)
        kp, kx = jax.random.split(key)
        params = init_params(kp, in_ch, out_ch)
        x = jax.random.normal(kx, (N, in_ch, H, W), jnp.float32)

        out, out2 = downsample_layer_forward(x, params, tile_h=tile_h,
                                             batch_tile=batch_tile, store_dtype=sdt)
        out = jax.block_until_ready(out)
        out2 = jax.block_until_ready(out2)

        assert out.shape == (N, out_ch, H, W)
        assert out2.shape == (N, out_ch, H // 2, W // 2)

        ref_out, ref_out2 = _reference_forward(x, params)
        assert jnp.allclose(out, ref_out, atol=tol, rtol=tol), (
            f"out mismatch at config H={H} dtype={sdt}")
        assert jnp.allclose(out2, ref_out2, atol=tol, rtol=tol), (
            f"out2 mismatch at config H={H} dtype={sdt}")

    print("KERNEL_OK")
</pallas_src>

<mosaic_0001>
module attributes {stable_mosaic.version = 11 : i64} {
  func.func @_conv1_kernel(%arg0: i32, %arg1: i32, %arg2: memref<2x16x64xf32, #tpu.memory_space<vmem>>, %arg3: memref<2x8x64xf32, #tpu.memory_space<vmem>>, %arg4: memref<2x8x64xf32, #tpu.memory_space<vmem>>, %arg5: memref<3x64x128xf32, #tpu.memory_space<vmem>>, %arg6: memref<1x128xf32, #tpu.memory_space<vmem>>, %arg7: memref<2x16x128xf32, #tpu.memory_space<vmem>>, %arg8: memref<1x1x2x128xf32, #tpu.memory_space<vmem>>) attributes {dimension_semantics = [#tpu.dimension_semantics<parallel>, #tpu.dimension_semantics<parallel>], iteration_bounds = array<i64: 1, 1>, scalar_prefetch = 0 : i64, scratch_operands = 0 : i64, tpu.core_type = #tpu.core_type<tc>, window_params = [{transform_indices = @transform_0, window_bounds = array<i64: 2, 16, 64>}, {transform_indices = @transform_1, window_bounds = array<i64: 2, 8, 64>}, {transform_indices = @transform_2, window_bounds = array<i64: 2, 8, 64>}, {pipeline_mode = #tpu.pipeline_mode<synchronous>, transform_indices = @transform_3, window_bounds = array<i64: 3, 64, 128>}, {pipeline_mode = #tpu.pipeline_mode<synchronous>, transform_indices = @transform_4, window_bounds = array<i64: 1, 128>}, {transform_indices = @transform_5, window_bounds = array<i64: 2, 16, 128>}, {transform_indices = @transform_6, window_bounds = array<i64: 1, 1, 2, 128>}]} {
    %c0 = arith.constant 0 : index
    %c0_0 = arith.constant 0 : index
    %c0_1 = arith.constant 0 : index
    %0 = vector.load %arg2[%c0, %c0_0, %c0_1] : memref<2x16x64xf32, #tpu.memory_space<vmem>>, vector<2x16x64xf32>
    %c0_2 = arith.constant 0 : index
    %c7 = arith.constant 7 : index
    %c0_3 = arith.constant 0 : index
    %1 = vector.load %arg3[%c0_2, %c7, %c0_3] : memref<2x8x64xf32, #tpu.memory_space<vmem>>, vector<2x1x64xf32>
    %c0_i32 = arith.constant 0 : i32
    %2 = arith.cmpi sgt, %arg1, %c0_i32 : i32
    %3 = arith.extui %2 : i1 to i32
    %4 = arith.sitofp %3 : i32 to f32
    %5 = vector.broadcast %4 : f32 to vector<2x1x64xf32>
    %6 = arith.mulf %1, %5 : vector<2x1x64xf32>
    %c0_4 = arith.constant 0 : index
    %c0_5 = arith.constant 0 : index
    %c0_6 = arith.constant 0 : index
    %7 = vector.load %arg4[%c0_4, %c0_5, %c0_6] : memref<2x8x64xf32, #tpu.memory_space<vmem>>, vector<2x1x64xf32>
    %c0_i32_7 = arith.constant 0 : i32
    %8 = arith.cmpi slt, %arg1, %c0_i32_7 : i32
    %9 = arith.extui %8 : i1 to i32
    %10 = arith.sitofp %9 : i32 to f32
    %11 = vector.broadcast %10 : f32 to vector<2x1x64xf32>
    %12 = arith.mulf %7, %11 : vector<2x1x64xf32>
    %13 = tpu.concatenate %6, %0, %12 in 1 : vector<2x1x64xf32>, vector<2x16x64xf32>, vector<2x1x64xf32> -> vector<2x18x64xf32>
    %14 = vector.extract_strided_slice %13 {offsets = [0, 0, 0], sizes = [2, 16, 64], strides = [1, 1, 1]} : vector<2x18x64xf32> to vector<2x16x64xf32>
    %15 = vector.shape_cast %14 : vector<2x16x64xf32> to vector<32x64xf32>
    %c0_8 = arith.constant 0 : index
    %c0_9 = arith.constant 0 : index
    %c0_10 = arith.constant 0 : index
    %16 = vector.load %arg5[%c0_8, %c0_9, %c0_10] : memref<3x64x128xf32, #tpu.memory_space<vmem>>, vector<1x64x128xf32>
    %17 = vector.shape_cast %16 : vector<1x64x128xf32> to vector<64x128xf32>
    %cst = arith.constant dense<0.000000e+00> : vector<32x128xf32>
    %18 = tpu.matmul %15, %17, %cst {dimension_numbers = #tpu.dot_dimension_numbers<[1], [0], [0], [1], [0, 0, 1, 1], [], []>} : vector<32x64xf32>, vector<64x128xf32>, vector<32x128xf32> -> vector<32x128xf32>
    %19 = vector.extract_strided_slice %13 {offsets = [0, 1, 0], sizes = [2, 16, 64], strides = [1, 1, 1]} : vector<2x18x64xf32> to vector<2x16x64xf32>
    %20 = vector.shape_cast %19 : vector<2x16x64xf32> to vector<32x64xf32>
    %c1 = arith.constant 1 : index
    %c0_11 = arith.constant 0 : index
    %c0_12 = arith.constant 0 : index
    %21 = vector.load %arg5[%c1, %c0_11, %c0_12] : memref<3x64x128xf32, #tpu.memory_space<vmem>>, vector<1x64x128xf32>
    %22 = vector.shape_cast %21 : vector<1x64x128xf32> to vector<64x128xf32>
    %cst_13 = arith.constant dense<0.000000e+00> : vector<32x128xf32>
    %23 = tpu.matmul %20, %22, %cst_13 {dimension_numbers = #tpu.dot_dimension_numbers<[1], [0], [0], [1], [0, 0, 1, 1], [], []>} : vector<32x64xf32>, vector<64x128xf32>, vector<32x128xf32> -> vector<32x128xf32>
    %24 = arith.addf %18, %23 : vector<32x128xf32>
    %25 = vector.extract_strided_slice %13 {offsets = [0, 2, 0], sizes = [2, 16, 64], strides = [1, 1, 1]} : vector<2x18x64xf32> to vector<2x16x64xf32>
    %26 = vector.shape_cast %25 : vector<2x16x64xf32> to vector<32x64xf32>
    %c2 = arith.constant 2 : index
    %c0_14 = arith.constant 0 : index
    %c0_15 = arith.constant 0 : index
    %27 = vector.load %arg5[%c2, %c0_14, %c0_15] : memref<3x64x128xf32, #tpu.memory_space<vmem>>, vector<1x64x128xf32>
    %28 = vector.shape_cast %27 : vector<1x64x128xf32> to vector<64x128xf32>
    %cst_16 = arith.constant dense<0.000000e+00> : vector<32x128xf32>
    %29 = tpu.matmul %26, %28, %cst_16 {dimension_numbers = #tpu.dot_dimension_numbers<[1], [0], [0], [1], [0, 0, 1, 1], [], []>} : vector<32x64xf32>, vector<64x128xf32>, vector<32x128xf32> -> vector<32x128xf32>
    %30 = arith.addf %24, %29 : vector<32x128xf32>
    %c0_17 = arith.constant 0 : index
    %c0_18 = arith.constant 0 : index
    %31 = vector.load %arg6[%c0_17, %c0_18] : memref<1x128xf32, #tpu.memory_space<vmem>>, vector<1x128xf32>
    %32 = vector.broadcast %31 : vector<1x128xf32> to vector<32x128xf32>
    %33 = arith.addf %30, %32 : vector<32x128xf32>
    %34 = vector.shape_cast %33 : vector<32x128xf32> to vector<2x16x128xf32>
    %c0_19 = arith.constant 0 : index
    %c0_20 = arith.constant 0 : index
    %c0_21 = arith.constant 0 : index
    %35 = vector.load %arg7[%c0_19, %c0_20, %c0_21] : memref<2x16x128xf32, #tpu.memory_space<vmem>>, vector<2x16x128xf32>
    tpu.vector_store %arg7[%c0_19, %c0_20, %c0_21], %34 {strides = array<i32>} : memref<2x16x128xf32, #tpu.memory_space<vmem>>, vector<2x16x128xf32>,
    %cst_22 = arith.constant dense<0.000000e+00> : vector<128xf32>
    %36 = vector.multi_reduction <add>, %33, %cst_22 [0] : vector<32x128xf32> to vector<128xf32>
    %37 = vector.shape_cast %36 : vector<128xf32> to vector<1x128xf32>
    %38 = arith.mulf %33, %33 : vector<32x128xf32>
    %cst_23 = arith.constant dense<0.000000e+00> : vector<128xf32>
    %39 = vector.multi_reduction <add>, %38, %cst_23 [0] : vector<32x128xf32> to vector<128xf32>
    %40 = vector.shape_cast %39 : vector<128xf32> to vector<1x128xf32>
    %41 = tpu.concatenate %37, %40 in 0 : vector<1x128xf32>, vector<1x128xf32> -> vector<2x128xf32>
    %c0_24 = arith.constant 0 : index
    %c0_25 = arith.constant 0 : index
    %c0_26 = arith.constant 0 : index
    %c0_27 = arith.constant 0 : index
    %42 = vector.load %arg8[%c0_24, %c0_25, %c0_26, %c0_27] : memref<1x1x2x128xf32, #tpu.memory_space<vmem>>, vector<1x1x2x128xf32>
    %43 = vector.shape_cast %42 : vector<1x1x2x128xf32> to vector<2x128xf32>
    %44 = vector.shape_cast %41 : vector<2x128xf32> to vector<1x1x2x128xf32>
    tpu.vector_store %arg8[%c0_24, %c0_25, %c0_26, %c0_27], %44 {strides = array<i32>} : memref<1x1x2x128xf32, #tpu.memory_space<vmem>>, vector<1x1x2x128xf32>,
    return
  }
  func.func @transform_0(%arg0: i32, %arg1: i32) -> (i32, i32, i32) {
    %c0_i32 = arith.constant 0 : i32
    %c0_i32_0 = arith.constant 0 : i32
    return %arg0, %arg1, %c0_i32 : i32, i32, i32
  }
  func.func @transform_1(%arg0: i32, %arg1: i32) -> (i32, i32, i32) {
    %c2_i32 = arith.constant 2 : i32
    %0 = arith.muli %arg1, %c2_i32 : i32
    %c1_i32 = arith.constant 1 : i32
    %1 = arith.subi %0, %c1_i32 : i32
    %c0_i32 = arith.constant 0 : i32
    %2 = arith.maxsi %1, %c0_i32 : i32
    %c0_i32_0 = arith.constant 0 : i32
    %c0_i32_1 = arith.constant 0 : i32
    return %arg0, %2, %c0_i32_0 : i32, i32, i32
  }
  func.func @transform_2(%arg0: i32, %arg1: i32) -> (i32, i32, i32) {
    %c1_i32 = arith.constant 1 : i32
    %0 = arith.addi %arg1, %c1_i32 : i32
    %c2_i32 = arith.constant 2 : i32
    %1 = arith.muli %0, %c2_i32 : i32
    %c1_i32_0 = arith.constant 1 : i32
    %2 = arith.minsi %1, %c1_i32_0 : i32
    %c0_i32 = arith.constant 0 : i32
    %c0_i32_1 = arith.constant 0 : i32
    return %arg0, %2, %c0_i32 : i32, i32, i32
  }
  func.func @transform_3(%arg0: i32, %arg1: i32) -> (i32, i32, i32) {
    %c0_i32 = arith.constant 0 : i32
    %c0_i32_0 = arith.constant 0 : i32
    %c0_i32_1 = arith.constant 0 : i32
    %c0_i32_2 = arith.constant 0 : i32
    return %c0_i32, %c0_i32_0, %c0_i32_1 : i32, i32, i32
  }
  func.func @transform_4(%arg0: i32, %arg1: i32) -> (i32, i32) {
    %c0_i32 = arith.constant 0 : i32
    %c0_i32_0 = arith.constant 0 : i32
    %c0_i32_1 = arith.constant 0 : i32
    return %c0_i32, %c0_i32_0 : i32, i32
  }
  func.func @transform_5(%arg0: i32, %arg1: i32) -> (i32, i32, i32) {
    %c0_i32 = arith.constant 0 : i32
    %c0_i32_0 = arith.constant 0 : i32
    return %arg0, %arg1, %c0_i32 : i32, i32, i32
  }
  func.func @transform_6(%arg0: i32, %arg1: i32) -> (i32, i32, i32, i32) {
    %c0_i32 = arith.constant 0 : i32
    %c0_i32_0 = arith.constant 0 : i32
    %c0_i32_1 = arith.constant 0 : i32
    return %arg0, %arg1, %c0_i32, %c0_i32_0 : i32, i32, i32, i32
  }
}

</mosaic_0001>

<bundles_post_ra>
// kernel: tpu_custom_call.1
= control target key start
LH: loop header
LB: loop body
LE: loop exit
PB: predicated region body
PF: predicated region fallthrough
CT: control target
= control target key end

     0   :  { %12 = vsyncpa [#allocation3], 0  ;;  %s946_s0 = inlined_call_operand.hbm [shape: f32[2,16,64], index: 0, kind: input, shape index: {}]   ;;  %s947_s1 = inlined_call_operand.hbm [shape: f32[2,16,64], index: 1, kind: input, shape index: {}]   ;;  %s948_s2 = inlined_call_operand.hbm [shape: f32[2,16,64], index: 2, kind: input, shape index: {}]   ;;  %s949_s3 = inlined_call_operand.hbm [shape: f32[3,64,128], index: 3, kind: input, shape index: {}]   ;;  %s950_s4 = inlined_call_operand.vmem [shape: f32[1,128], index: 4, kind: input, shape index: {}]   ;;  %s951_s5 = inlined_call_operand.hbm [shape: f32[2,16,128], index: 5, kind: output, shape index: {0}]   ;;  %s952_s6 = inlined_call_operand.hbm [shape: f32[1,1,2,128], index: 6, kind: output, shape index: {1}]  }
   0x1   :  { %13 = vsyncpa [#allocation6], 0 }
   0x2   :  { %14 = vsyncpa [#allocation9], 0 }
   0x3   :  { %15 = vsyncpa [#allocation4], 0 }
   0x4   :  { %16 = vsyncpa [#allocation12], 0  ;;  %s829_s21 = smov [#allocation5]   ;;  %s830_s23 = smov [#allocation2]  }
   0x5   :  { %s40_s22 = sshll.u32 %s829_s21, 4  ;;  %s22_s24 = sshll.u32 %s830_s23, 4  ;;  %s41_s22 = int_to_ptr.vmem [resolvable:$true] %s40_s22  ;;  %s23_s24 = int_to_ptr.vmem [resolvable:$true] %s22_s24 }
   0x6   :  { %s704_s25 = scalar_lea.vmem %s41_s22, 256  ;;  %p709_p1 = scmp.lt.s32.totalorder %s41_s22, %s41_s22 }
   0x7   :  { %p705_p0 = scmp.ne.s32.totalorder %s41_s22, %s704_s25  ;;  %p710_p2 = scmp.lt.s32.totalorder %s704_s25, %s704_s25 }
   0x9   :  { %p711_p3 = por %p710_p2, %p709_p1 }
   0xb   :  { %p712_p4 = pnand %p711_p3, %p705_p0 }
   0xd   :  { %715 = shalt.err (!%p712_p4)
}
   0xe   :  { %s831_s26 = smov 256   ;;  %s832_s27 = smov 128  }
   0xf   :  { %s833_s28 = smov 8   ;;  %s57_s9 = scalar_lea.hbm %s948_s2, 128 }
  0x10   :  { %46 = dma.hbm_to_vmem [thread:$0]  %s947_s1, 256, %s41_s22, [#allocation6], %s831_s26, %s832_s27, %s833_s28  }
  0x11   :  { %s724_s10 = scalar_lea.vmem %s23_s24, 512  ;;  %p729_p6 = scmp.lt.s32.totalorder %s23_s24, %s23_s24 }
  0x12   :  { %p725_p5 = scmp.ne.s32.totalorder %s23_s24, %s724_s10  ;;  %p730_p7 = scmp.lt.s32.totalorder %s724_s10, %s724_s10 }
  0x14   :  { %p731_p8 = por %p730_p7, %p729_p6 }
  0x16   :  { %p732_p9 = pnand %p731_p8, %p725_p5 }
  0x18   :  { %735 = shalt.err (!%p732_p9)
}
  0x19   :  { %28 = dma.hbm_to_vmem [thread:$0]  %s946_s0, 512, %s23_s24, [#allocation3], %s832_s27, %s832_s27, %s833_s28  }
  0x1a   :  { %s834_s1 = smov [#allocation7]   ;;  %s835_s14 = smov [#allocation8]  }
  0x1b   :  { %s58_s13 = sshll.u32 %s834_s1, 4  ;;  %s70_s15 = sshll.u32 %s835_s14, 4  ;;  %s59_s13 = int_to_ptr.vmem [resolvable:$true] %s58_s13  ;;  %s71_s15 = int_to_ptr.vmem [resolvable:$true] %s70_s15 }
  0x1c   :  { %s746_s2 = scalar_lea.vmem %s59_s13, 256  ;;  %p751_p11 = scmp.lt.s32.totalorder %s59_s13, %s59_s13 }
  0x1d   :  { %p747_p10 = scmp.ne.s32.totalorder %s59_s13, %s746_s2  ;;  %p752_p12 = scmp.lt.s32.totalorder %s746_s2, %s746_s2 }
  0x1f   :  { %p753_p13 = por %p752_p12, %p751_p11 }
  0x21   :  { %p754_p0 = pnand %p753_p13, %p747_p10 }
  0x23   :  { %757 = shalt.err (!%p754_p0)
}
  0x24   :  { %64 = dma.hbm_to_vmem [thread:$0]  %s57_s9, 256, %s59_s13, [#allocation6], %s831_s26, %s832_s27, %s833_s28  }
  0x25   :  { %s767_s16 = scalar_lea.vmem %s71_s15, 3072  ;;  %p772_p2 = scmp.lt.s32.totalorder %s71_s15, %s71_s15 }
  0x26   :  { %p768_p1 = scmp.ne.s32.totalorder %s71_s15, %s767_s16  ;;  %p773_p3 = scmp.lt.s32.totalorder %s767_s16, %s767_s16 }
  0x28   :  { %p774_p4 = por %p773_p3, %p772_p2 }
  0x2a   :  { %p775_p5 = pnand %p774_p4, %p768_p1 }
  0x2c   :  { %778 = shalt.err (!%p775_p5)
}
  0x2d   :  { %76 = dma.hbm_to_vmem [thread:$0]  %s949_s3, 3072, %s71_s15, [#allocation9], %s832_s27, %s832_s27, %s833_s28  }
  0x2e   :  { %819 = dma.done.wait [#allocation3], 512  }
  0x2f   :  { %820 = vsyncadd [#allocation3], 4294966784 }
  0x30   :  { %821 = dma.done.wait [#allocation6], 512  }
  0x31   :  { %822 = vsyncadd [#allocation6], 4294966784 }
  0x32   :  { %823 = dma.done.wait [#allocation9], 3072  }
  0x33   :  { %824 = vsyncadd [#allocation9], 4294964224  ;;  %v175_v0 = vld [vmem:[#allocation8 + $0x78] sm:$0xff]  ;;  %v174_v2 = vld [vmem:[#allocation8 + $0x70] sm:$0xff]  ;;  %vm123_vm0 = vcmask 1040384   ;;  %vm156_vm1 = vcmask 1046528  }
  0x34   :  { %v151_v1 = vld [vmem:[#allocation8 + $0x38] sm:$0xff]  ;;  %605 = vmatprep.subr.mxu0 %v175_v0  ;;  %v150_v3 = vld [vmem:[#allocation8 + $0x30] sm:$0xff]  ;;  %v173_v4 = vld [vmem:[#allocation8 + $0x68] sm:$0xff]  ;;  %vm176_vm2 = vcmask 523264   ;;  %vm363_vm3 = vcmask 1045504   ;;  %s836_s19 = smov [#allocation10]  }
  0x35   :  { %627 = vmatprep.subr.mxu1 %v151_v1  ;;  %606 = vmatpush3.msra.mxu0 %v175_v0  ;;  %v149_v5 = vld [vmem:[#allocation8 + $0x28] sm:$0xff]  ;;  %v172_v6 = vld [vmem:[#allocation8 + $0x60] sm:$0xff]  ;;  %v171_v8 = vld [vmem:[#allocation8 + $0x58] sm:$0xff]  ;;  %s524_s20 = sshll.u32 %s836_s19, 4  ;;  %s525_s20 = int_to_ptr.vmem [resolvable:$true] %s524_s20 }
  0x36   :  { %628 = vmatpush3.msra.mxu1 %v151_v1  ;;  %607 = vmatprep.subr.mxu0 %v174_v2  ;;  %v148_v7 = vld [vmem:[#allocation8 + $0x20] sm:$0xff]  ;;  %v147_v9 = vld [vmem:[#allocation8 + $0x18] sm:$0xff]  ;;  %v100_v11 = vld [vmem:[#allocation2 + $0x8] sm:$0xff]  ;;  %p784_p7 = scmp.lt.s32.totalorder %s525_s20, %s525_s20 }
  0x37   :  { %629 = vmatprep.subr.mxu1 %v150_v3  ;;  %608 = vmatpush3.msra.mxu0 %v174_v2  ;;  %v99_v10 = vld [vmem:[#allocation2] sm:$0xff]  ;;  %v125_v14 = vrot.slane %v100_v11, 7  ;;  %v111_v15 = vld [vmem:[#allocation7] sm:$0x1]  ;;  %v169_v24 = vld [vmem:[#allocation8 + $0x48] sm:$0xff] }
  0x38   :  { %630 = vmatpush3.msra.mxu1 %v150_v3  ;;  %609 = vmatprep.subr.mxu0 %v173_v4  ;;  %v103_v12 = vld [vmem:[#allocation5 + $0x7] sm:$0x1]  ;;  %v124_v13 = vrot.slane %v99_v10, 7  ;;  %v117_v17 = vmul.f32 0.0, %v111_v15  ;;  %v170_v18 = vld [vmem:[#allocation8 + $0x50] sm:$0xff]  ;;  %v145_v25 = vld [vmem:[#allocation8 + $0x8] sm:$0xff] }
  0x39   :  { %631 = vmatprep.subr.mxu1 %v149_v5  ;;  %610 = vmatpush3.msra.mxu0 %v173_v4  ;;  %v109_v16 = vmul.f32 0.0, %v103_v12  ;;  %v146_v19 = vld [vmem:[#allocation8 + $0x10] sm:$0xff]  ;;  %v112_v27 = vld [vmem:[#allocation7 + $0x8] sm:$0x1]  ;;  %v104_v31 = vld [vmem:[#allocation5 + $0xf] sm:$0x1] }
  0x3a   :  { %632 = vmatpush3.msra.mxu1 %v149_v5  ;;  %611 = vmatprep.subr.mxu0 %v172_v6  ;;  %v898_v20 = vsel %vm123_vm0, %v124_v13, %v125_v14  ;;  %v136_v23 = vrot.slane %v117_v17, 7  ;;  %v101_v29 = vld [vmem:[#allocation2 + $0x10] sm:$0xff]  ;;  %v102_v30 = vld [vmem:[#allocation2 + $0x18] sm:$0xff]  ;;  %v168_v32 = vld [vmem:[#allocation8 + $0x40] sm:$0xff]  ;;  %v118_v35 = vmul.f32 0.0, %v112_v27  ;;  %v110_v37 = vmul.f32 0.0, %v104_v31 }
  0x3b   :  { %633 = vmatprep.subr.mxu1 %v148_v7  ;;  %612 = vmatpush3.msra.mxu0 %v172_v6  ;;  %v901_v21 = vsel %vm123_vm0, %v109_v16, %v124_v13  ;;  %v158_v22 = vrot.slane %v898_v20, 1  ;;  %v144_v33 = vld [vmem:[#allocation8] sm:$0xff]  ;;  %v127_v38 = vrot.slane %v101_v29, 7  ;;  %v128_v39 = vrot.slane %v102_v30, 7  ;;  %v382_v41 = vld [vmem:[#allocation8 + $0xb8] sm:$0xff]  ;;  %v381_v43 = vld [vmem:[#allocation8 + $0xb0] sm:$0xff] }
  0x3c   :  { %634 = vmatpush3.msra.mxu1 %v148_v7  ;;  %613 = vmatprep.subr.mxu0 %v171_v8  ;;  %v157_v26 = vrot.slane %v901_v21, 1  ;;  %v906_v28 = vsel %vm123_vm0, %v125_v14, %v136_v23  ;;  %v137_v42 = vrot.slane %v118_v35, 7  ;;  %v380_v46 = vld [vmem:[#allocation8 + $0xa8] sm:$0xff]  ;;  %v379_v50 = vld [vmem:[#allocation8 + $0xa0] sm:$0xff]  ;;  %v378_v52 = vld [vmem:[#allocation8 + $0x98] sm:$0xff]  ;;  %v364_v57 = vrot.slane %v901_v21, 2 }
  0x3d   :  { %635 = vmatprep.subr.mxu1 %v147_v9  ;;  %614 = vmatpush3.msra.mxu0 %v171_v8  ;;  %v160_v34 = vrot.slane %v906_v28, 1  ;;  %v129_v44 = vsel %vm123_vm0, %v127_v38, %v128_v39  ;;  %v141_v45 = vsel %vm123_vm0, %v110_v37, %v127_v38  ;;  %v377_v55 = vld [vmem:[#allocation8 + $0x90] sm:$0xff]  ;;  %v376_v56 = vld [vmem:[#allocation8 + $0x88] sm:$0xff]  ;;  %v365_v58 = vrot.slane %v898_v20, 2  ;;  %v375_v63 = vld [vmem:[#allocation8 + $0x80] sm:$0xff] }
  0x3e   :  { %636 = vmatpush3.msra.mxu1 %v147_v9  ;;  %615 = vmatprep.subr.mxu0 %v170_v18  ;;  %v159_v36 = vsel %vm156_vm1, %v157_v26, %v158_v22  ;;  %v143_v47 = vsel %vm123_vm0, %v128_v39, %v137_v42  ;;  %v162_v48 = vrot.slane %v141_v45, 1  ;;  %v163_v49 = vrot.slane %v129_v44, 1  ;;  %v568_v15 = vld [vmem:[%s950_s4] ss:$0 sm:$0xff]  ;;  %s779_s4 = scalar_lea.vmem %s525_s20, 512 }
  0x3f   :  { %637 = vmatprep.subr.mxu1 %v146_v19  ;;  %616 = vmatpush3.msra.mxu0 %v170_v18  ;;  %v161_v40 = vsel %vm156_vm1, %v158_v22, %v160_v34  ;;  %v165_v51 = vrot.slane %v143_v47, 1  ;;  %v369_v59 = vrot.slane %v141_v45, 2  ;;  %v370_v60 = vrot.slane %v129_v44, 2  ;;  %p780_p6 = scmp.ne.s32.totalorder %s525_s20, %s779_s4  ;;  %p785_p8 = scmp.lt.s32.totalorder %s779_s4, %s779_s4 }
  0x40   :  { %638 = vmatpush3.msra.mxu1 %v146_v19  ;;  %617 = vmatprep.subr.mxu0 %v169_v24  ;;  %v164_v53 = vsel %vm156_vm1, %v162_v48, %v163_v49  ;;  %v367_v61 = vrot.slane %v906_v28, 2  ;;  %v372_v62 = vrot.slane %v143_v47, 2  ;;  %v366_v0 = vsel %vm363_vm3, %v364_v57, %v365_v58 }
  0x41   :  { %639 = vmatprep.subr.mxu1 %v145_v25  ;;  %618 = vmatpush3.msra.mxu0 %v169_v24  ;;  %v166_v54 = vsel %vm156_vm1, %v163_v49, %v165_v51  ;;  %v371_v1 = vsel %vm363_vm3, %v369_v59, %v370_v60  ;;  %p786_p9 = por %p785_p8, %p784_p7 }
  0x42   :  { %640 = vmatpush3.msra.mxu1 %v145_v25  ;;  %619 = vmatprep.subr.mxu0 %v168_v32  ;;  %v368_v2 = vsel %vm363_vm3, %v365_v58, %v367_v61  ;;  %v373_v3 = vsel %vm363_vm3, %v370_v60, %v372_v62 }
  0x43   :  { %641 = vmatprep.subr.mxu1 %v144_v33  ;;  %620 = vmatpush3.msra.mxu0 %v168_v32  ;;  %p787_p10 = pnand %p786_p9, %p780_p6 }
  0x44   :  { %621 = vmatprep.mubr.msk.f32.mxu0 %vm176_vm2, %v159_v36  ;;  %642 = vmatpush3.msra.mxu1 %v144_v33 }
  0x45   :  { %643 = vmatprep.mubr.msk.f32.mxu1 %vm176_vm2, %v901_v21  ;;  %622 = vmatmul.mubr.msk.f32.vlgmr.msra.gmra.mxu0 %vm176_vm2, %v161_v40 }
  0x46   :  { %644 = vmatmul.mubr.msk.f32.vlgmr.msra.gmra.mxu1 %vm176_vm2, %v898_v20  ;;  %649 = vmatprep.subr.mxu0 %v382_v41 }
  0x47   :  { %671 = vmatprep.subr.mxu1 %v382_v41  ;;  %650 = vmatpush3.msra.mxu0 %v382_v41 }
  0x48   :  { %679 = vmatpush3.msra.mxu1 %v382_v41  ;;  %651 = vmatprep.subr.mxu0 %v381_v43 }
  0x49   :  { %672 = vmatprep.subr.mxu1 %v381_v43  ;;  %652 = vmatpush3.msra.mxu0 %v381_v43 }
  0x4a   :  { %680 = vmatpush3.msra.mxu1 %v381_v43  ;;  %653 = vmatprep.subr.mxu0 %v380_v46 }
  0x4b   :  { %673 = vmatprep.subr.mxu1 %v380_v46  ;;  %654 = vmatpush3.msra.mxu0 %v380_v46 }
  0x4c   :  { %681 = vmatpush3.msra.mxu1 %v380_v46  ;;  %655 = vmatprep.subr.mxu0 %v379_v50 }
  0x4d   :  { %674 = vmatprep.subr.mxu1 %v379_v50  ;;  %656 = vmatpush3.msra.mxu0 %v379_v50 }
  0x4e   :  { %682 = vmatpush3.msra.mxu1 %v379_v50  ;;  %657 = vmatprep.subr.mxu0 %v378_v52 }
  0x4f   :  { %675 = vmatprep.subr.mxu1 %v378_v52  ;;  %624 = vmatprep.mubr.msk.f32.mxu0 %vm176_vm2, %v164_v53 }
  0x50   :  { %646 = vmatprep.mubr.msk.f32.mxu1 %vm176_vm2, %v141_v45  ;;  %658 = vmatpush3.msra.mxu0 %v378_v52 }
  0x51   :  { %683 = vmatpush3.msra.mxu1 %v378_v52  ;;  %625 = vmatmul.mubr.msk.f32.gmra.mxu0 %vm176_vm2, %v166_v54 }
  0x52   :  { %647 = vmatmul.mubr.msk.f32.gmra.mxu1 %vm176_vm2, %v129_v44  ;;  %659 = vmatprep.subr.mxu0 %v377_v55 }
  0x53   :  { %676 = vmatprep.subr.mxu1 %v377_v55  ;;  %660 = vmatpush3.msra.mxu0 %v377_v55 }
  0x54   :  { %684 = vmatpush3.msra.mxu1 %v377_v55  ;;  %661 = vmatprep.subr.mxu0 %v376_v56 }
  0x55   :  { %677 = vmatprep.subr.mxu1 %v376_v56  ;;  %662 = vmatpush3.msra.mxu0 %v376_v56 }
  0x56   :  { %685 = vmatpush3.msra.mxu1 %v376_v56  ;;  %663 = vmatprep.subr.mxu0 %v375_v63 }
  0x57   :  { %678 = vmatprep.subr.mxu1 %v375_v63  ;;  %664 = vmatpush3.msra.mxu0 %v375_v63 }
  0x58   :  { %686 = vmatpush3.msra.mxu1 %v375_v63  ;;  %665 = vmatprep.mubr.msk.f32.mxu0 %vm176_vm2, %v366_v0 }
  0x59   :  { %668 = vmatprep.mubr.msk.f32.mxu1 %vm176_vm2, %v371_v1  ;;  %666 = vmatmul.mubr.msk.f32.vlgmr.msra.gmra.mxu0 %vm176_vm2, %v368_v2 }
  0x5a   :  { %669 = vmatmul.mubr.msk.f32.vlgmr.msra.gmra.mxu1 %vm176_vm2, %v373_v3 }
 0x105   :  { %v623_v4 = vpop.f32.mrf.mxu0 }
 0x106   :  { %v645_v5 = vpop.f32.mrf.mxu1 }
 0x107   :  { %v251_v6 = vpop.f32.mrf.mxu0  ;;  %v350_v12 = vadd.f32 %v645_v5, %v623_v4 }
 0x108   :  { %v344_v7 = vpop.f32.mrf.mxu1 }
 0x109   :  { %v345_v17 = vadd.f32 %v344_v7, %v251_v6 }
 0x111   :  { %v626_v8 = vpop.f32.mrf.mxu0 }
 0x112   :  { %v648_v9 = vpop.f32.mrf.mxu1 }
 0x113   :  { %v261_v10 = vpop.f32.mrf.mxu0  ;;  %v360_v13 = vadd.f32 %v648_v9, %v626_v8 }
 0x114   :  { %v354_v11 = vpop.f32.mrf.mxu1 }
 0x115   :  { %v355_v18 = vadd.f32 %v354_v11, %v261_v10 }
 0x119   :  { %v667_v14 = vpop.f32.mrf.mxu0 }
 0x11a   :  { %v670_v16 = vpop.f32.mrf.mxu1  ;;  %v477_v19 = vadd.f32 %v667_v14, %v350_v12 }
 0x11b   :  { %v479_v20 = vadd.f32 %v670_v16, %v360_v13  ;;  %v457_v21 = vpop.f32.mrf.mxu0 }
 0x11c   :  { %v467_v22 = vpop.f32.mrf.mxu1  ;;  %v488_v23 = vadd.f32 %v568_v15, %v477_v19  ;;  %v476_v25 = vadd.f32 %v457_v21, %v345_v17 }
 0x11d   :  { %v490_v24 = vadd.f32 %v568_v15, %v479_v20  ;;  %v478_v26 = vadd.f32 %v467_v22, %v355_v18 }
 0x11e   :  { %492 = vst [vmem:[#allocation10 + $0x8] sm:$0xff] %v488_v23  ;;  %v487_v27 = vadd.f32 %v568_v15, %v476_v25  ;;  %v505_v29 = vmul.f32 %v488_v23, %v488_v23 }
 0x11f   :  { %494 = vst [vmem:[#allocation10 + $0x18] sm:$0xff] %v490_v24  ;;  %v489_v28 = vadd.f32 %v568_v15, %v478_v26 }
 0x120   :  { %491 = vst [vmem:[#allocation10] sm:$0xff] %v487_v27  ;;  %v495_v30 = vadd.f32 %v488_v23, %v487_v27  ;;  %v504_v31 = vmul.f32 %v487_v27, %v487_v27 }
 0x121   :  { %493 = vst [vmem:[#allocation10 + $0x10] sm:$0xff] %v489_v28 }
 0x122   :  { %790 = shalt.err (!%p787_p10)
}
 0x123   :  { %530 = dma.vmem_to_hbm [thread:$0]  %s525_s20, 512, %s951_s5, [#allocation4], %s832_s27, %s832_s27, %s833_s28   ;;  %v508_v32 = vadd.f32 %v505_v29, %v504_v31  ;;  %v496_v33 = vadd.f32 %v495_v30, %v489_v28  ;;  %v506_v34 = vmul.f32 %v489_v28, %v489_v28  ;;  %v507_v35 = vmul.f32 %v490_v24, %v490_v24 }
 0x124   :  { %s837_s23 = smov [#allocation11]  }
 0x125   :  { %v497_v36 = vadd.f32 %v496_v33, %v490_v24  ;;  %v509_v37 = vadd.f32 %v508_v32, %v506_v34  ;;  %s537_s24 = sshll.u32 %s837_s23, 4  ;;  %s538_s24 = int_to_ptr.vmem [resolvable:$true] %s537_s24 }
 0x126   :  { %s799_s5 = scalar_lea.vmem %s538_s24, 32  ;;  %p804_p12 = scmp.lt.s32.totalorder %s538_s24, %s538_s24 }
 0x127   :  { %v498_v38 = vrot.slane %v497_v36, 4  ;;  %v510_v39 = vadd.f32 %v509_v37, %v507_v35  ;;  %p800_p11 = scmp.ne.s32.totalorder %s538_s24, %s799_s5  ;;  %p805_p13 = scmp.lt.s32.totalorder %s799_s5, %s799_s5 }
 0x129   :  { %v499_v40 = vadd.f32 %v498_v38, %v497_v36  ;;  %v511_v41 = vrot.slane %v510_v39, 4  ;;  %p806_p0 = por %p805_p13, %p804_p12 }
 0x12b   :  { %v500_v42 = vrot.slane %v499_v40, 2  ;;  %v512_v43 = vadd.f32 %v511_v41, %v510_v39  ;;  %p807_p1 = pnand %p806_p0, %p800_p11 }
 0x12d   :  { %v501_v44 = vadd.f32 %v500_v42, %v499_v40  ;;  %v513_v45 = vrot.slane %v512_v43, 2 }
 0x12f   :  { %v502_v46 = vrot.slane %v501_v44, 1  ;;  %v514_v47 = vadd.f32 %v513_v45, %v512_v43 }
 0x131   :  { %v515_v48 = vrot.slane %v514_v47, 1  ;;  %v503_v49 = vadd.f32 %v502_v46, %v501_v44 }
 0x133   :  { %v516_v50 = vadd.f32 %v515_v48, %v514_v47 }
 0x135   :  { %v517_v51 = vsel %vm123_vm0, %v503_v49, %v516_v50 }
 0x136   :  { %518 = vst [vmem:[#allocation11] sm:$0x3] %v517_v51 }
 0x137   :  { %810 = shalt.err (!%p807_p1)
}
 0x138   :  { %540 = dma.vmem_to_hbm [thread:$0]  %s538_s24, 32, %s952_s6, [#allocation12]  }
 0x139   :  { %825 = dma.done.wait [#allocation4], 512  }
 0x13a   :  { %826 = vsyncadd [#allocation4], 4294966784 }
 0x13b   :  { %827 = dma.done.wait [#allocation12], 32  }
 0x13c   :  { %828 = vsyncadd [#allocation12], 4294967264 }
 0x13d   :  { %547 = vsyncpa [#allocation3], 1 }
 0x13e   :  { %548 = vsyncpa [#allocation6], 1 }
 0x13f   :  { %549 = vsyncpa [#allocation9], 1 }
 0x140   :  { %550 = vsyncpa [#allocation4], 1 }
 0x141   :  { %551 = vsyncpa [#allocation12], 1 }

</bundles_post_ra>
